<compile_context>
chip_gen: v7x
topology: tpu7x:2x2x1
jax: 0.10.0
libtpu: 0.0.40
codegen_flags: <defaults>
</compile_context>

<pallas_src>
from functools import partial

import numpy as np
import jax
import jax.numpy as jnp
from jax.experimental import pallas as pl
from jax.experimental.pallas import tpu as pltpu


# ----------------------------------------------------------------------------
# Anchor generation (deterministic "parameters" of the module, plain numpy glue)
# ----------------------------------------------------------------------------
def _whctrs(anchor):
    w = anchor[2] - anchor[0] + 1.0
    h = anchor[3] - anchor[1] + 1.0
    x_ctr = anchor[0] + 0.5 * (w - 1.0)
    y_ctr = anchor[1] + 0.5 * (h - 1.0)
    return w, h, x_ctr, y_ctr


def _mkanchors(ws, hs, x_ctr, y_ctr):
    ws = ws[:, np.newaxis]
    hs = hs[:, np.newaxis]
    return np.hstack((x_ctr - 0.5 * (ws - 1.0),
                      y_ctr - 0.5 * (hs - 1.0),
                      x_ctr + 0.5 * (ws - 1.0),
                      y_ctr + 0.5 * (hs - 1.0)))


def _ratio_enum(anchor, ratios):
    w, h, x_ctr, y_ctr = _whctrs(anchor)
    size = w * h
    size_ratios = size / ratios
    ws = np.round(np.sqrt(size_ratios))
    hs = np.round(ws * ratios)
    return _mkanchors(ws, hs, x_ctr, y_ctr)


def _scale_enum(anchor, scales):
    w, h, x_ctr, y_ctr = _whctrs(anchor)
    ws = w * scales
    hs = h * scales
    return _mkanchors(ws, hs, x_ctr, y_ctr)


def generate_anchors(base_size=16, ratios=(0.5, 1.0, 2.0), scales=2 ** np.arange(3, 6)):
    ratios = np.array(ratios, dtype=np.float64)
    scales = np.array(scales, dtype=np.float64)
    base_anchor = np.array([1, 1, base_size, base_size], dtype=np.float64) - 1.0
    ratio_anchors = _ratio_enum(base_anchor, ratios)
    anchors = np.vstack([_scale_enum(ratio_anchors[i, :], scales)
                         for i in range(ratio_anchors.shape[0])])
    return anchors.astype(np.float32)


def generate_all_anchors(width, height, stride, base_anchors):
    # base_anchors: (1, A, 4)
    shift_x = np.arange(0, width) * stride
    shift_y = np.arange(0, height) * stride
    shift_x, shift_y = np.meshgrid(shift_x, shift_y)
    shifts = np.vstack((shift_x.ravel(), shift_y.ravel(),
                        shift_x.ravel(), shift_y.ravel())).transpose()
    A = base_anchors.shape[1]
    K = shifts.shape[0]
    anchors = base_anchors.reshape((1, A, 4)) + shifts.reshape((K, 1, 4))
    return anchors.reshape((K * A, 4)).astype(np.float32)


def py_cpu_nms(dets, thresh):
    x1, y1, x2, y2, scores = dets[:, 0], dets[:, 1], dets[:, 2], dets[:, 3], dets[:, 4]
    areas = (x2 - x1 + 1.0) * (y2 - y1 + 1.0)
    order = scores.argsort()[::-1]
    keep = []
    while order.size > 0:
        i = order[0]
        keep.append(int(i))
        xx1 = np.maximum(x1[i], x1[order[1:]])
        yy1 = np.maximum(y1[i], y1[order[1:]])
        xx2 = np.minimum(x2[i], x2[order[1:]])
        yy2 = np.minimum(y2[i], y2[order[1:]])
        w = np.maximum(0.0, xx2 - xx1 + 1.0)
        h = np.maximum(0.0, yy2 - yy1 + 1.0)
        inter = w * h
        ovr = inter / (areas[i] + areas[order[1:]] - inter)
        inds = np.where(ovr <= thresh)[0]
        order = order[inds + 1]
    return keep


# ----------------------------------------------------------------------------
# Layout plan: fields live as dense (Rpad, LANES) f32 planes, tiled over rows.
# ----------------------------------------------------------------------------
NEG = -1e30            # "rejected / padded" sentinel score (contract: real scores >> NEG)
LANES = 512            # lane-dense plane width (multiple of 128)


def _block_plan(p):
    """Return (rpad, rblk): sublane rows padded/blocked so each block is (rblk, LANES),
    rblk a multiple of 8, blocks 4k..32k anchors, and >=2 grid steps when possible
    (v7x megacore).  Candidate rblk chosen to minimize row padding."""
    rows = -(-p // LANES)
    rows8 = max(8, ((rows + 7) // 8) * 8)
    if rows8 <= 8:
        return 8, 8                                   # tiny problem: single block
    cap = max(8, min(64, ((rows8 // 2) // 8) * 8))    # force >=2 blocks, cap 64 rows
    best_rpad, best_rblk = None, None
    for rb in range(cap, 7, -8):
        rp = -(-rows8 // rb) * rb
        if best_rpad is None or rp < best_rpad:
            best_rpad, best_rblk = rp, rb
    return best_rpad, best_rblk


# ----------------------------------------------------------------------------
# Pallas kernel: box decode + clip + min-size filter + score masking
# ----------------------------------------------------------------------------
def proposal_kernel(info_ref, anc_ref, del_ref, scr_ref, box_ref, msc_ref):
    # info_ref (SMEM, (3,)):           [im_h, im_w, scale]
    # anc_ref  (VMEM, (4, Rblk, L)):   pre-decoded anchors: ctr_x, ctr_y, w, h
    # del_ref  (VMEM, (4, Rblk, L)):   bbox deltas: dx, dy, dw, dh
    # scr_ref  (VMEM, (Rblk, L)):      fg scores (padded lanes already = NEG)
    # box_ref  (VMEM, (4, Rblk, L)):   clipped boxes x1, y1, x2, y2
    # msc_ref  (VMEM, (Rblk, L)):      score if kept by min-size filter, else NEG
    im_h = info_ref[0]
    im_w = info_ref[1]
    min_size = 16.0 * info_ref[2]

    ctr_x = anc_ref[0, :, :]
    ctr_y = anc_ref[1, :, :]
    aw = anc_ref[2, :, :]
    ah = anc_ref[3, :, :]
    dx = del_ref[0, :, :]
    dy = del_ref[1, :, :]
    dw = del_ref[2, :, :]
    dh = del_ref[3, :, :]

    pred_ctr_x = dx * aw + ctr_x
    pred_ctr_y = dy * ah + ctr_y
    pred_w = jnp.exp(dw) * aw
    pred_h = jnp.exp(dh) * ah

    # decode + clip_boxes
    x1 = jnp.clip(pred_ctr_x - 0.5 * pred_w, 0.0, im_w - 1.0)
    y1 = jnp.clip(pred_ctr_y - 0.5 * pred_h, 0.0, im_h - 1.0)
    x2 = jnp.clip(pred_ctr_x + 0.5 * pred_w, 0.0, im_w - 1.0)
    y2 = jnp.clip(pred_ctr_y + 0.5 * pred_h, 0.0, im_h - 1.0)

    # filter_boxes: both sides >= 16 * scale; otherwise score -> NEG sentinel
    keep = jnp.logical_and(x2 - x1 + 1.0 >= min_size, y2 - y1 + 1.0 >= min_size)
    msc_ref[...] = jnp.where(keep, scr_ref[...], NEG)

    box_ref[0, :, :] = x1
    box_ref[1, :, :] = y1
    box_ref[2, :, :] = x2
    box_ref[3, :, :] = y2


@partial(jax.jit, static_argnames=("a", "rpad", "rblk", "topk"))
def _rpn_device(bbox_deltas, scores, anchor_planes, im_info, *, a, rpad, rblk, topk):
    """Device pipeline: field-plane repack -> Pallas decode kernel -> exact top-k + gather."""
    n, c4, h, w = bbox_deltas.shape            # n == 1
    p = h * w * a
    ppad = rpad * LANES

    # deltas: NCHW (1, 4A, H, W) -> (4, P) field planes in (h, w, a) order
    # TODO(synk): could read NCHW directly in-kernel (grid over H/W, unpack 4A channels
    # inside) to drop this transpose pass; kept in XLA for clarity (single fused pass).
    d = bbox_deltas.reshape(a, 4, h, w)
    d = jnp.transpose(d, (1, 2, 3, 0)).reshape(4, p)
    d = jnp.pad(d, ((0, 0), (0, ppad - p))).reshape(4, rpad, LANES)

    # fg scores: channels A: -> (P,) in (h, w, a) order, padded lanes = NEG
    fg = scores.reshape(2 * a, h, w)[a:, :, :]
    s = jnp.transpose(fg, (1, 2, 0)).reshape(p)
    s = jnp.pad(s, (0, ppad - p), constant_values=NEG).reshape(rpad, LANES)

    boxes, mscores = pl.pallas_call(
        proposal_kernel,
        out_shape=(jax.ShapeDtypeStruct((4, rpad, LANES), jnp.float32),
                   jax.ShapeDtypeStruct((rpad, LANES), jnp.float32)),
        grid=(rpad // rblk,),
        in_specs=[
            pl.BlockSpec(memory_space=pltpu.MemorySpace.SMEM),          # im_info scalars
            pl.BlockSpec((4, rblk, LANES), lambda i: (0, i, 0)),        # anchor planes
            pl.BlockSpec((4, rblk, LANES), lambda i: (0, i, 0)),        # delta planes
            pl.BlockSpec((rblk, LANES), lambda i: (i, 0)),              # fg scores
        ],
        out_specs=(pl.BlockSpec((4, rblk, LANES), lambda i: (0, i, 0)),  # boxes
                   pl.BlockSpec((rblk, LANES), lambda i: (i, 0))),       # masked score
        compiler_params=pltpu.CompilerParams(
            dimension_semantics=("parallel",)),
    )(im_info, anchor_planes, d, s)

    # Exact top-k to match the reference argsort ordering (approx_max_k would be
    # faster on large images but is not order-exact).
    flat_scores = mscores.reshape(-1)
    top_scores, top_idx = jax.lax.top_k(flat_scores, topk)             # descending
    top_boxes = jnp.take(boxes.reshape(4, -1), top_idx, axis=1).T      # (topk, 4)
    return top_boxes, top_scores


# ----------------------------------------------------------------------------
# ProposalGenerator forward
# ----------------------------------------------------------------------------
class ProposalGenerator:
    def __init__(self, stride=16):
        self.ANCHOR_BASE_SIZE = 16
        self._STRIDE = stride
        self._BASE_ANCHORS = generate_anchors(self.ANCHOR_BASE_SIZE)[np.newaxis, :]
        self._NUM_ANCHORS_PER_BOX = self._BASE_ANCHORS.shape[1]
        self._anchor_cache = {}      # (H, W) -> device (4, Rpad, LANES) pre-decoded planes

    def _anchors_device(self, width, height, rpad):
        key = (height, width)
        if key not in self._anchor_cache:
            anc = generate_all_anchors(width, height, self._STRIDE, self._BASE_ANCHORS)
            aw = anc[:, 2] - anc[:, 0] + 1.0
            ah = anc[:, 3] - anc[:, 1] + 1.0
            cx = anc[:, 0] + 0.5 * aw
            cy = anc[:, 1] + 0.5 * ah
            planes = np.stack([cx, cy, aw, ah], axis=0).astype(np.float32)   # (4, P)
            ppad = rpad * LANES
            pad = np.zeros((4, ppad - planes.shape[1]), dtype=np.float32)
            pad[2:, :] = 1.0     # benign width/height for padded lanes (scores are NEG anyway)
            planes = np.concatenate([planes, pad], axis=1).reshape(4, rpad, LANES)
            self._anchor_cache[key] = jnp.asarray(planes)                    # resident on device
        return self._anchor_cache[key]

    def forward(self, bbox_deltas, scores, image_info):
        # bbox_deltas: (N, 4*A, H, W) ; scores: (N, 2*A, H, W) ; NCHW like PyTorch.
        bbox_deltas = jnp.asarray(bbox_deltas, dtype=jnp.float32)
        scores = jnp.asarray(scores, dtype=jnp.float32)
        n = scores.shape[0]
        if n != 1:
            # Reference module only pairs anchors correctly for a single image.
            raise ValueError("ProposalGenerator assumes batch size 1 (like the reference).")

        width = scores.shape[3]
        height = scores.reshape(n, 18, -1, width).shape[2]
        a = self._NUM_ANCHORS_PER_BOX
        p = n * height * width * a

        rpad, rblk = _block_plan(p)
        anchor_planes = self._anchors_device(width, height, rpad)
        topk = min(12000, p)

        im_info = jnp.array([image_info[0], image_info[1], image_info[2]], dtype=jnp.float32)

        top_boxes, top_scores = _rpn_device(bbox_deltas, scores, anchor_planes, im_info,
                                            a=a, rpad=rpad, rblk=rblk, topk=topk)
        jax.block_until_ready((top_boxes, top_scores))
        top_boxes = np.asarray(top_boxes)
        top_scores = np.asarray(top_scores)

        # drop min-size-rejected / padded candidates (sentinel score == NEG)
        valid = top_scores > (NEG * 0.5)
        proposals = top_boxes[valid, :]
        kept_scores = top_scores[valid].reshape(-1, 1).astype(np.float32)

        # TODO(synk): greedy NMS is a data-dependent loop with dynamic output size;
        # kept on host in numpy (the reference PyTorch module also does it in numpy).
        keep = py_cpu_nms(np.hstack((proposals, kept_scores)), 0.7)
        keep = keep[:2000]
        proposals = proposals[keep, :]
        kept_scores = kept_scores[keep]

        batch_idx = np.zeros((proposals.shape[0], 1), dtype=np.float32)
        blob = np.hstack((batch_idx, proposals.astype(np.float32, copy=False)))
        return jnp.asarray(blob), jnp.asarray(kept_scores)


if __name__ == "__main__":
    key = jax.random.PRNGKey(0)
    k1, k2 = jax.random.split(key)

    N, H, W = 1, 16, 16                      # batch=1 (module assumes single image)
    stride = 16
    scores = jax.random.normal(k1, (N, 18, H, W), dtype=jnp.float32)
    bbox_deltas = 0.1 * jax.random.normal(k2, (N, 36, H, W), dtype=jnp.float32)
    image_info = (float(H * stride), float(W * stride), 1.0)      # (im_h, im_w, scale)

    gen = ProposalGenerator(stride=stride)
    blob, out_scores = gen.forward(bbox_deltas, scores, image_info)
    jax.block_until_ready((blob, out_scores))

    assert blob.ndim == 2 and blob.shape[1] == 5
    assert out_scores.shape[0] == blob.shape[0]
    print("KERNEL_OK")
</pallas_src>

<mosaic_0001>
module attributes {stable_mosaic.version = 11 : i64} {
  func.func private @main(%arg0: i32) attributes {dimension_semantics = [#tpu.dimension_semantics<core_parallel>], iteration_bounds = array<i64: 2>, tpu.core_type = #tpu.core_type<sc_scalar_subcore>, window_params = []} {
    return
  }
}

module attributes {stable_mosaic.version = 11 : i64} {
  func.func private @main(%arg0: i32) attributes {dimension_semantics = [#tpu.dimension_semantics<core_parallel>], iteration_bounds = array<i64: 2>, tpu.core_type = #tpu.core_type<sc_scalar_subcore>, window_params = []} {
    return
  }
}

module attributes {stable_mosaic.version = 11 : i64} {
  func.func @proposal_kernel(%arg0: i32, %arg1: memref<3xf32, #tpu.memory_space<smem>>, %arg2: memref<4x8x512xf32, #tpu.memory_space<vmem>>, %arg3: memref<4x8x512xf32, #tpu.memory_space<vmem>>, %arg4: memref<8x512xf32, #tpu.memory_space<vmem>>, %arg5: memref<4x8x512xf32, #tpu.memory_space<vmem>>, %arg6: memref<8x512xf32, #tpu.memory_space<vmem>>) attributes {dimension_semantics = [#tpu.dimension_semantics<parallel>], iteration_bounds = array<i64: 1>, scalar_prefetch = 0 : i64, scratch_operands = 0 : i64, tpu.core_type = #tpu.core_type<tc>, window_params = [{transform_indices = @transform_0, window_bounds = array<i64: 3>}, {transform_indices = @transform_1, window_bounds = array<i64: 4, 8, 512>}, {transform_indices = @transform_2, window_bounds = array<i64: 4, 8, 512>}, {transform_indices = @transform_3, window_bounds = array<i64: 8, 512>}, {transform_indices = @transform_4, window_bounds = array<i64: 4, 8, 512>}, {transform_indices = @transform_5, window_bounds = array<i64: 8, 512>}]} {
    %c0 = arith.constant 0 : index
    %0 = memref.load %arg1[%c0] : memref<3xf32, #tpu.memory_space<smem>>
    %c1 = arith.constant 1 : index
    %1 = memref.load %arg1[%c1] : memref<3xf32, #tpu.memory_space<smem>>
    %c2 = arith.constant 2 : index
    %2 = memref.load %arg1[%c2] : memref<3xf32, #tpu.memory_space<smem>>
    %cst = arith.constant 1.600000e+01 : f32
    %3 = arith.mulf %cst, %2 : f32
    %c0_0 = arith.constant 0 : index
    %c0_1 = arith.constant 0 : index
    %c0_2 = arith.constant 0 : index
    %4 = vector.load %arg2[%c0_0, %c0_1, %c0_2] : memref<4x8x512xf32, #tpu.memory_space<vmem>>, vector<1x8x512xf32>
    %5 = vector.shape_cast %4 : vector<1x8x512xf32> to vector<8x512xf32>
    %c1_3 = arith.constant 1 : index
    %c0_4 = arith.constant 0 : index
    %c0_5 = arith.constant 0 : index
    %6 = vector.load %arg2[%c1_3, %c0_4, %c0_5] : memref<4x8x512xf32, #tpu.memory_space<vmem>>, vector<1x8x512xf32>
    %7 = vector.shape_cast %6 : vector<1x8x512xf32> to vector<8x512xf32>
    %c2_6 = arith.constant 2 : index
    %c0_7 = arith.constant 0 : index
    %c0_8 = arith.constant 0 : index
    %8 = vector.load %arg2[%c2_6, %c0_7, %c0_8] : memref<4x8x512xf32, #tpu.memory_space<vmem>>, vector<1x8x512xf32>
    %9 = vector.shape_cast %8 : vector<1x8x512xf32> to vector<8x512xf32>
    %c3 = arith.constant 3 : index
    %c0_9 = arith.constant 0 : index
    %c0_10 = arith.constant 0 : index
    %10 = vector.load %arg2[%c3, %c0_9, %c0_10] : memref<4x8x512xf32, #tpu.memory_space<vmem>>, vector<1x8x512xf32>
    %11 = vector.shape_cast %10 : vector<1x8x512xf32> to vector<8x512xf32>
    %c0_11 = arith.constant 0 : index
    %c0_12 = arith.constant 0 : index
    %c0_13 = arith.constant 0 : index
    %12 = vector.load %arg3[%c0_11, %c0_12, %c0_13] : memref<4x8x512xf32, #tpu.memory_space<vmem>>, vector<1x8x512xf32>
    %13 = vector.shape_cast %12 : vector<1x8x512xf32> to vector<8x512xf32>
    %c1_14 = arith.constant 1 : index
    %c0_15 = arith.constant 0 : index
    %c0_16 = arith.constant 0 : index
    %14 = vector.load %arg3[%c1_14, %c0_15, %c0_16] : memref<4x8x512xf32, #tpu.memory_space<vmem>>, vector<1x8x512xf32>
    %15 = vector.shape_cast %14 : vector<1x8x512xf32> to vector<8x512xf32>
    %c2_17 = arith.constant 2 : index
    %c0_18 = arith.constant 0 : index
    %c0_19 = arith.constant 0 : index
    %16 = vector.load %arg3[%c2_17, %c0_18, %c0_19] : memref<4x8x512xf32, #tpu.memory_space<vmem>>, vector<1x8x512xf32>
    %17 = vector.shape_cast %16 : vector<1x8x512xf32> to vector<8x512xf32>
    %c3_20 = arith.constant 3 : index
    %c0_21 = arith.constant 0 : index
    %c0_22 = arith.constant 0 : index
    %18 = vector.load %arg3[%c3_20, %c0_21, %c0_22] : memref<4x8x512xf32, #tpu.memory_space<vmem>>, vector<1x8x512xf32>
    %19 = vector.shape_cast %18 : vector<1x8x512xf32> to vector<8x512xf32>
    %20 = arith.mulf %13, %9 : vector<8x512xf32>
    %21 = arith.addf %20, %5 : vector<8x512xf32>
    %22 = arith.mulf %15, %11 : vector<8x512xf32>
    %23 = arith.addf %22, %7 : vector<8x512xf32>
    %24 = math.exp %17 : vector<8x512xf32>
    %25 = arith.mulf %24, %9 : vector<8x512xf32>
    %26 = math.exp %19 : vector<8x512xf32>
    %27 = arith.mulf %26, %11 : vector<8x512xf32>
    %cst_23 = arith.constant 5.000000e-01 : f32
    %28 = vector.broadcast %cst_23 : f32 to vector<8x512xf32>
    %29 = arith.mulf %28, %25 : vector<8x512xf32>
    %30 = arith.subf %21, %29 : vector<8x512xf32>
    %cst_24 = arith.constant 1.000000e+00 : f32
    %31 = arith.subf %1, %cst_24 : f32
    %cst_25 = arith.constant 0.000000e+00 : f32
    %32 = vector.broadcast %cst_25 : f32 to vector<8x512xf32>
    %33 = arith.maximumf %32, %30 : vector<8x512xf32>
    %34 = vector.broadcast %31 : f32 to vector<8x512xf32>
    %35 = arith.minimumf %34, %33 : vector<8x512xf32>
    %cst_26 = arith.constant 5.000000e-01 : f32
    %36 = vector.broadcast %cst_26 : f32 to vector<8x512xf32>
    %37 = arith.mulf %36, %27 : vector<8x512xf32>
    %38 = arith.subf %23, %37 : vector<8x512xf32>
    %cst_27 = arith.constant 1.000000e+00 : f32
    %39 = arith.subf %0, %cst_27 : f32
    %cst_28 = arith.constant 0.000000e+00 : f32
    %40 = vector.broadcast %cst_28 : f32 to vector<8x512xf32>
    %41 = arith.maximumf %40, %38 : vector<8x512xf32>
    %42 = vector.broadcast %39 : f32 to vector<8x512xf32>
    %43 = arith.minimumf %42, %41 : vector<8x512xf32>
    %cst_29 = arith.constant 5.000000e-01 : f32
    %44 = vector.broadcast %cst_29 : f32 to vector<8x512xf32>
    %45 = arith.mulf %44, %25 : vector<8x512xf32>
    %46 = arith.addf %21, %45 : vector<8x512xf32>
    %cst_30 = arith.constant 1.000000e+00 : f32
    %47 = arith.subf %1, %cst_30 : f32
    %cst_31 = arith.constant 0.000000e+00 : f32
    %48 = vector.broadcast %cst_31 : f32 to vector<8x512xf32>
    %49 = arith.maximumf %48, %46 : vector<8x512xf32>
    %50 = vector.broadcast %47 : f32 to vector<8x512xf32>
    %51 = arith.minimumf %50, %49 : vector<8x512xf32>
    %cst_32 = arith.constant 5.000000e-01 : f32
    %52 = vector.broadcast %cst_32 : f32 to vector<8x512xf32>
    %53 = arith.mulf %52, %27 : vector<8x512xf32>
    %54 = arith.addf %23, %53 : vector<8x512xf32>
    %cst_33 = arith.constant 1.000000e+00 : f32
    %55 = arith.subf %0, %cst_33 : f32
    %cst_34 = arith.constant 0.000000e+00 : f32
    %56 = vector.broadcast %cst_34 : f32 to vector<8x512xf32>
    %57 = arith.maximumf %56, %54 : vector<8x512xf32>
    %58 = vector.broadcast %55 : f32 to vector<8x512xf32>
    %59 = arith.minimumf %58, %57 : vector<8x512xf32>
    %60 = arith.subf %51, %35 : vector<8x512xf32>
    %cst_35 = arith.constant 1.000000e+00 : f32
    %61 = vector.broadcast %cst_35 : f32 to vector<8x512xf32>
    %62 = arith.addf %60, %61 : vector<8x512xf32>
    %63 = vector.broadcast %3 : f32 to vector<8x512xf32>
    %64 = arith.cmpf oge, %62, %63 : vector<8x512xf32>
    %65 = arith.subf %59, %43 : vector<8x512xf32>
    %cst_36 = arith.constant 1.000000e+00 : f32
    %66 = vector.broadcast %cst_36 : f32 to vector<8x512xf32>
    %67 = arith.addf %65, %66 : vector<8x512xf32>
    %68 = vector.broadcast %3 : f32 to vector<8x512xf32>
    %69 = arith.cmpf oge, %67, %68 : vector<8x512xf32>
    %70 = arith.andi %64, %69 : vector<8x512xi1>
    %c0_37 = arith.constant 0 : index
    %c0_38 = arith.constant 0 : index
    %71 = vector.load %arg4[%c0_37, %c0_38] : memref<8x512xf32, #tpu.memory_space<vmem>>, vector<8x512xf32>
    %cst_39 = arith.constant -1.000000e+30 : f32
    %72 = vector.broadcast %cst_39 : f32 to vector<8x512xf32>
    %73 = arith.select %70, %71, %72 : vector<8x512xi1>, vector<8x512xf32>
    %c0_40 = arith.constant 0 : index
    %c0_41 = arith.constant 0 : index
    %74 = vector.load %arg6[%c0_40, %c0_41] : memref<8x512xf32, #tpu.memory_space<vmem>>, vector<8x512xf32>
    tpu.vector_store %arg6[%c0_40, %c0_41], %73 {strides = array<i32>} : memref<8x512xf32, #tpu.memory_space<vmem>>, vector<8x512xf32>,
    %c0_42 = arith.constant 0 : index
    %c0_43 = arith.constant 0 : index
    %c0_44 = arith.constant 0 : index
    %75 = vector.load %arg5[%c0_42, %c0_43, %c0_44] : memref<4x8x512xf32, #tpu.memory_space<vmem>>, vector<1x8x512xf32>
    %76 = vector.shape_cast %75 : vector<1x8x512xf32> to vector<8x512xf32>
    %77 = vector.shape_cast %35 : vector<8x512xf32> to vector<1x8x512xf32>
    tpu.vector_store %arg5[%c0_42, %c0_43, %c0_44], %77 {strides = array<i32>} : memref<4x8x512xf32, #tpu.memory_space<vmem>>, vector<1x8x512xf32>,
    %c1_45 = arith.constant 1 : index
    %c0_46 = arith.constant 0 : index
    %c0_47 = arith.constant 0 : index
    %78 = vector.load %arg5[%c1_45, %c0_46, %c0_47] : memref<4x8x512xf32, #tpu.memory_space<vmem>>, vector<1x8x512xf32>
    %79 = vector.shape_cast %78 : vector<1x8x512xf32> to vector<8x512xf32>
    %80 = vector.shape_cast %43 : vector<8x512xf32> to vector<1x8x512xf32>
    tpu.vector_store %arg5[%c1_45, %c0_46, %c0_47], %80 {strides = array<i32>} : memref<4x8x512xf32, #tpu.memory_space<vmem>>, vector<1x8x512xf32>,
    %c2_48 = arith.constant 2 : index
    %c0_49 = arith.constant 0 : index
    %c0_50 = arith.constant 0 : index
    %81 = vector.load %arg5[%c2_48, %c0_49, %c0_50] : memref<4x8x512xf32, #tpu.memory_space<vmem>>, vector<1x8x512xf32>
    %82 = vector.shape_cast %81 : vector<1x8x512xf32> to vector<8x512xf32>
    %83 = vector.shape_cast %51 : vector<8x512xf32> to vector<1x8x512xf32>
    tpu.vector_store %arg5[%c2_48, %c0_49, %c0_50], %83 {strides = array<i32>} : memref<4x8x512xf32, #tpu.memory_space<vmem>>, vector<1x8x512xf32>,
    %c3_51 = arith.constant 3 : index
    %c0_52 = arith.constant 0 : index
    %c0_53 = arith.constant 0 : index
    %84 = vector.load %arg5[%c3_51, %c0_52, %c0_53] : memref<4x8x512xf32, #tpu.memory_space<vmem>>, vector<1x8x512xf32>
    %85 = vector.shape_cast %84 : vector<1x8x512xf32> to vector<8x512xf32>
    %86 = vector.shape_cast %59 : vector<8x512xf32> to vector<1x8x512xf32>
    tpu.vector_store %arg5[%c3_51, %c0_52, %c0_53], %86 {strides = array<i32>} : memref<4x8x512xf32, #tpu.memory_space<vmem>>, vector<1x8x512xf32>,
    return
  }
  func.func @transform_0(%arg0: i32) -> i32 {
    %c0_i32 = arith.constant 0 : i32
    %c0_i32_0 = arith.constant 0 : i32
    return %c0_i32 : i32
  }
  func.func @transform_1(%arg0: i32) -> (i32, i32, i32) {
    %c0_i32 = arith.constant 0 : i32
    %c0_i32_0 = arith.constant 0 : i32
    %c0_i32_1 = arith.constant 0 : i32
    return %c0_i32, %arg0, %c0_i32_0 : i32, i32, i32
  }
  func.func @transform_2(%arg0: i32) -> (i32, i32, i32) {
    %c0_i32 = arith.constant 0 : i32
    %c0_i32_0 = arith.constant 0 : i32
    %c0_i32_1 = arith.constant 0 : i32
    return %c0_i32, %arg0, %c0_i32_0 : i32, i32, i32
  }
  func.func @transform_3(%arg0: i32) -> (i32, i32) {
    %c0_i32 = arith.constant 0 : i32
    %c0_i32_0 = arith.constant 0 : i32
    return %arg0, %c0_i32 : i32, i32
  }
  func.func @transform_4(%arg0: i32) -> (i32, i32, i32) {
    %c0_i32 = arith.constant 0 : i32
    %c0_i32_0 = arith.constant 0 : i32
    %c0_i32_1 = arith.constant 0 : i32
    return %c0_i32, %arg0, %c0_i32_0 : i32, i32, i32
  }
  func.func @transform_5(%arg0: i32) -> (i32, i32) {
    %c0_i32 = arith.constant 0 : i32
    %c0_i32_0 = arith.constant 0 : i32
    return %arg0, %c0_i32 : i32, i32
  }
}

</mosaic_0001>

<bundles_post_ra>
// kernel: _rpn_device.1
= control target key start
LH: loop header
LB: loop body
LE: loop exit
PB: predicated region body
PF: predicated region fallthrough
CT: control target
= control target key end

     0   :  { %11 = vsyncpa [#allocation3], 0  ;;  %s587_s0 = inlined_call_operand.vmem [shape: f32[3], index: 0, kind: input, shape index: {}]   ;;  %s588_s1 = inlined_call_operand.vmem [shape: f32[4,8,512], index: 1, kind: input, shape index: {}]   ;;  %s589_s2 = inlined_call_operand.vmem [shape: f32[4,8,512], index: 2, kind: input, shape index: {}]   ;;  %s590_s3 = inlined_call_operand.vmem [shape: f32[8,512], index: 3, kind: input, shape index: {}]   ;;  %s591_s4 = inlined_call_operand.vmem [shape: f32[4,8,512], index: 4, kind: output, shape index: {0}]   ;;  %s592_s5 = inlined_call_operand.vmem [shape: f32[8,512], index: 5, kind: output, shape index: {1}]  }
   0x1   :  { %s18_s20 = sshll.u32 %s587_s0, 4  ;;  %s19_s20 = int_to_ptr.vmem [resolvable:$true] %s18_s20 }
   0x2   :  { %s300_s21 = scalar_lea.vmem %s19_s20, 16  ;;  %p305_p1 = scmp.lt.s32.totalorder %s19_s20, %s19_s20 }
   0x3   :  { %p301_p0 = scmp.ne.s32.totalorder %s19_s20, %s300_s21  ;;  %p306_p2 = scmp.lt.s32.totalorder %s300_s21, %s300_s21 }
   0x5   :  { %p307_p3 = por %p306_p2, %p305_p1 }
   0x7   :  { %p308_p4 = pnand %p307_p3, %p301_p0 }
   0x9   :  { %311 = shalt.err (!%p308_p4)
}
   0xa   :  { %s314_s22 = smov [#allocation2]  }
   0xb   :  { %21 = dma.vmem_to_smem %s19_s20, 16, %s314_s22, [#allocation3]  }
   0xc   :  { %312 = dma.done.wait [#allocation3], 16  }
   0xd   :  { %313 = vsyncadd [#allocation3], 4294967280 }
   0xe   :  { %31 = sfence }
   0xf   :  { %v261_v0 = vld [vmem:[%s589_s2 + $0x40] sm:$0xff]  ;;  %s354_s0 = sld [smem:[#allocation2 + $0x1]]  ;;  %s356_s27 = sld [smem:[#allocation2]]  ;;  %v262_v4 = vld [vmem:[%s589_s2 + $0x48] sm:$0xff]  ;;  %v263_v14 = vld [vmem:[%s589_s2 + $0x50] sm:$0xff] }
  0x10   :  { %v265_v1 = vld [vmem:[%s589_s2 + $0x60] sm:$0xff]  ;;  %v90_v2 = vmul.f32 1.442695, %v261_v0  ;;  %s361_s30 = sld [smem:[#allocation2 + $0x2]]  ;;  %v266_v5 = vld [vmem:[%s589_s2 + $0x68] sm:$0xff]  ;;  %v267_v15 = vld [vmem:[%s589_s2 + $0x70] sm:$0xff] }
  0x11   :  { %v102_v3 = vmul.f32 1.442695, %v265_v1  ;;  %v92_v6 = vmul.f32 1.442695, %v262_v4  ;;  %v249_v7 = vld [vmem:[%s588_s1 + $0x40] sm:$0xff]  ;;  %v250_v12 = vld [vmem:[%s588_s1 + $0x48] sm:$0xff] }
  0x12   :  { %284 = vpow2.f32 %v90_v2  ;;  %v253_v8 = vld [vmem:[%s588_s1 + $0x60] sm:$0xff]  ;;  %v104_v9 = vmul.f32 1.442695, %v266_v5  ;;  %v254_v13 = vld [vmem:[%s588_s1 + $0x68] sm:$0xff]  ;;  %v94_v18 = vmul.f32 1.442695, %v263_v14 }
  0x13   :  { %286 = vpow2.f32 %v102_v3  ;;  %v55_v10 = vld [vmem:[%s589_s2] sm:$0xff]  ;;  %v56_v16 = vld [vmem:[%s589_s2 + $0x8] sm:$0xff]  ;;  %v106_v19 = vmul.f32 1.442695, %v267_v15  ;;  %v409_v25 = vld [vmem:[%s588_s1 + $0x50] sm:$0xff] }
  0x14   :  { %v257_v11 = vld [vmem:[%s589_s2 + $0x20] sm:$0xff]  ;;  %288 = vpow2.f32 %v92_v6  ;;  %v258_v17 = vld [vmem:[%s589_s2 + $0x28] sm:$0xff]  ;;  %v74_v22 = vmul.f32 %v249_v7, %v55_v10  ;;  %v57_v26 = vld [vmem:[%s589_s2 + $0x10] sm:$0xff]  ;;  %v75_v28 = vmul.f32 %v250_v12, %v56_v16 }
  0x15   :  { %290 = vpow2.f32 %v104_v9  ;;  %v36_v20 = vld [vmem:[%s588_s1] sm:$0xff]  ;;  %v82_v23 = vmul.f32 %v257_v11, %v253_v8  ;;  %s269_s9 = sadd.f32 -1.0, %s354_s0  ;;  %v37_v24 = vld [vmem:[%s588_s1 + $0x8] sm:$0xff]  ;;  %v264_v27 = vld [vmem:[%s589_s2 + $0x58] sm:$0xff]  ;;  %v83_v29 = vmul.f32 %v258_v17, %v254_v13  ;;  %v76_v40 = vmul.f32 %v409_v25, %v57_v26 }
  0x16   :  { %v245_v21 = vld [vmem:[%s588_s1 + $0x20] sm:$0xff]  ;;  %v420_v30 = vld [vmem:[%s588_s1 + $0x70] sm:$0xff]  ;;  %292 = vpow2.f32 %v94_v18  ;;  %v268_v32 = vld [vmem:[%s589_s2 + $0x78] sm:$0xff]  ;;  %v96_v33 = vmul.f32 1.442695, %v264_v27  ;;  %s35_s23 = smul.f32 16.0, %s361_s30  ;;  %v78_v38 = vadd.f32 %v74_v22, %v36_v20  ;;  %v79_v50 = vadd.f32 %v75_v28, %v37_v24 }
  0x17   :  { %v259_v31 = vld [vmem:[%s589_s2 + $0x30] sm:$0xff]  ;;  %s270_s24 = sadd.f32 -1.0, %s356_s27  ;;  %v246_v34 = vld [vmem:[%s588_s1 + $0x28] sm:$0xff]  ;;  %294 = vpow2.f32 %v106_v19  ;;  %v436_v35 = vld [vmem:[%s588_s1 + $0x58] sm:$0xff]  ;;  %v86_v39 = vadd.f32 %v245_v21, %v82_v23  ;;  %v108_v43 = vmul.f32 1.442695, %v268_v32  ;;  %v450_v46 = vstv %s269_s9 }
  0x18   :  { %v58_v36 = vld [vmem:[%s589_s2 + $0x18] sm:$0xff]  ;;  %v38_v47 = vld [vmem:[%s588_s1 + $0x10] sm:$0xff]  ;;  %v84_v48 = vmul.f32 %v259_v31, %v420_v30  ;;  %296 = vpow2.f32 %v96_v33  ;;  %v87_v51 = vadd.f32 %v246_v34, %v83_v29  ;;  %v462_v57 = vstv %s35_s23 }
  0x19   :  { %v445_v41 = vld [vmem:[%s588_s1 + $0x78] sm:$0xff]  ;;  %v247_v52 = vld [vmem:[%s588_s1 + $0x30] sm:$0xff]  ;;  %v77_v53 = vmul.f32 %v436_v35, %v58_v36  ;;  %v460_v56 = vstv %s270_s24  ;;  %v468_v63 = vadd.f32 %v76_v40, %v38_v47  ;;  %298 = vpow2.f32 %v108_v43 }
  0x1a   :  { %v260_v42 = vld [vmem:[%s589_s2 + $0x38] sm:$0xff]  ;;  %v473_v4 = vadd.f32 %v247_v52, %v84_v48  ;;  %v203_v48 = vld [vmem:[%s590_s3] sm:$0xff] }
  0x1b   :  { %v39_v58 = vld [vmem:[%s588_s1 + $0x18] sm:$0xff]  ;;  %v85_v59 = vmul.f32 %v260_v42, %v445_v41 }
  0x1c   :  { %v285_v37 = vpop.eup %284  ;;  %v248_v0 = vld [vmem:[%s588_s1 + $0x38] sm:$0xff] }
  0x1d   :  { %v287_v44 = vpop.eup %286  ;;  %v98_v45 = vmul.f32 %v285_v37, %v249_v7 }
  0x1e   :  { %v110_v49 = vmul.f32 %v287_v44, %v253_v8  ;;  %v289_v54 = vpop.eup %288  ;;  %v475_v8 = vadd.f32 %v77_v53, %v39_v58 }
  0x1f   :  { %v114_v55 = vmul.f32 0.5, %v98_v45  ;;  %v291_v60 = vpop.eup %290  ;;  %v99_v62 = vmul.f32 %v289_v54, %v250_v12  ;;  %v477_v12 = vadd.f32 %v248_v0, %v85_v59 }
  0x20   :  { %v132_v61 = vmul.f32 0.5, %v110_v49  ;;  %v111_v3 = vmul.f32 %v291_v60, %v254_v13  ;;  %v293_v14 = vpop.eup %292 }
  0x21   :  { %v118_v1 = vsub.f32 %v78_v38, %v114_v55  ;;  %v150_v2 = vadd.f32 %v114_v55, %v78_v38  ;;  %v115_v7 = vmul.f32 0.5, %v99_v62  ;;  %v295_v19 = vpop.eup %294  ;;  %v100_v33 = vmul.f32 %v293_v14, %v409_v25 }
  0x22   :  { %v136_v5 = vsub.f32 %v86_v39, %v132_v61  ;;  %v162_v6 = vadd.f32 %v132_v61, %v86_v39  ;;  %v133_v11 = vmul.f32 0.5, %v111_v3  ;;  %v297_v28 = vpop.eup %296  ;;  %v112_v38 = vmul.f32 %v295_v19, %v420_v30  ;;  %v204_v61 = vld [vmem:[%s590_s3 + $0x8] sm:$0xff] }
  0x23   :  { %v123_v9 = vmax.f32 %v118_v1, 0.0  ;;  %v154_v10 = vmax.f32 %v150_v2, 0.0  ;;  %v119_v17 = vsub.f32 %v79_v50, %v115_v7  ;;  %v151_v18 = vadd.f32 %v115_v7, %v79_v50  ;;  %v299_v43 = vpop.eup %298 }
  0x24   :  { %v141_v15 = vmax.f32 %v136_v5, 0.0  ;;  %v166_v16 = vmax.f32 %v162_v6, 0.0  ;;  %v137_v21 = vsub.f32 %v87_v51, %v133_v11  ;;  %v163_v22 = vadd.f32 %v133_v11, %v87_v51 }
  0x25   :  { %v128_v13 = vmin.f32 %v450_v46, %v123_v9  ;;  %v158_v20 = vmin.f32 %v450_v46, %v154_v10  ;;  %v124_v26 = vmax.f32 %v119_v17, 0.0  ;;  %v155_v27 = vmax.f32 %v151_v18, 0.0 }
  0x26   :  { %v146_v23 = vmin.f32 %v460_v56, %v141_v15  ;;  %v170_v24 = vmin.f32 %v460_v56, %v166_v16  ;;  %v142_v31 = vmax.f32 %v137_v21, 0.0  ;;  %v167_v32 = vmax.f32 %v163_v22, 0.0 }
  0x27   :  { %v174_v29 = vsub.f32 %v158_v20, %v128_v13  ;;  %215 = vst [vmem:[%s591_s4] sm:$0xff] %v128_v13  ;;  %275 = vst [vmem:[%s591_s4 + $0x40] sm:$0xff] %v158_v20  ;;  %v129_v36 = vmin.f32 %v450_v46, %v124_v26  ;;  %v159_v37 = vmin.f32 %v450_v46, %v155_v27  ;;  %v116_v42 = vmul.f32 0.5, %v100_v33  ;;  %v205_v13 = vld [vmem:[%s590_s3 + $0x10] sm:$0xff]  ;;  %v206_v27 = vld [vmem:[%s590_s3 + $0x18] sm:$0xff] }
  0x28   :  { %v187_v34 = vsub.f32 %v170_v24, %v146_v23  ;;  %271 = vst [vmem:[%s591_s4 + $0x20] sm:$0xff] %v146_v23  ;;  %279 = vst [vmem:[%s591_s4 + $0x60] sm:$0xff] %v170_v24  ;;  %v147_v40 = vmin.f32 %v460_v56, %v142_v31  ;;  %v171_v25 = vmin.f32 %v460_v56, %v167_v32  ;;  %v134_v47 = vmul.f32 0.5, %v112_v38 }
  0x29   :  { %v178_v39 = vadd.f32 1.0, %v174_v29  ;;  %v175_v45 = vsub.f32 %v159_v37, %v129_v36  ;;  %216 = vst [vmem:[%s591_s4 + $0x8] sm:$0xff] %v129_v36  ;;  %276 = vst [vmem:[%s591_s4 + $0x48] sm:$0xff] %v159_v37  ;;  %v101_v30 = vmul.f32 %v297_v28, %v436_v35  ;;  %v120_v50 = vsub.f32 %v468_v63, %v116_v42 }
  0x2a   :  { %v191_v44 = vadd.f32 1.0, %v187_v34  ;;  %v188_v49 = vsub.f32 %v171_v25, %v147_v40  ;;  %272 = vst [vmem:[%s591_s4 + $0x28] sm:$0xff] %v147_v40  ;;  %280 = vst [vmem:[%s591_s4 + $0x68] sm:$0xff] %v171_v25  ;;  %v152_v51 = vadd.f32 %v116_v42, %v468_v63  ;;  %v138_v52 = vsub.f32 %v473_v4, %v134_v47 }
  0x2b   :  { %vm183_vm0 = vcmp.ge.f32.partialorder %v178_v39, %v462_v57  ;;  %v179_v35 = vadd.f32 1.0, %v175_v45  ;;  %v164_v53 = vadd.f32 %v134_v47, %v473_v4  ;;  %v125_v55 = vmax.f32 %v120_v50, 0.0 }
  0x2c   :  { %vm195_vm1 = vcmp.ge.f32.partialorder %v191_v44, %v462_v57  ;;  %v192_v54 = vadd.f32 1.0, %v188_v49  ;;  %v156_v58 = vmax.f32 %v152_v51, 0.0  ;;  %v113_v59 = vmul.f32 %v299_v43, %v445_v41 }
  0x2d   :  { %vm199_vm2 = vmand %vm183_vm0, %vm195_vm1  ;;  %vm184_vm3 = vcmp.ge.f32.partialorder %v179_v35, %v462_v57  ;;  %v143_v62 = vmax.f32 %v138_v52, 0.0  ;;  %v168_v63 = vmax.f32 %v164_v53, 0.0  ;;  %v130_v0 = vmin.f32 %v450_v46, %v125_v55 }
  0x2e   :  { %v207_v60 = vsel %vm199_vm2, %v203_v48, -1e+30  ;;  %vm196_vm4 = vcmp.ge.f32.partialorder %v192_v54, %v462_v57  ;;  %v160_v1 = vmin.f32 %v450_v46, %v156_v58  ;;  %v117_v41 = vmul.f32 0.5, %v101_v30 }
  0x2f   :  { %211 = vst [vmem:[%s592_s5] sm:$0xff] %v207_v60  ;;  %vm200_vm5 = vmand %vm184_vm3, %vm196_vm4  ;;  %v148_v2 = vmin.f32 %v460_v56, %v143_v62  ;;  %v172_v3 = vmin.f32 %v460_v56, %v168_v63  ;;  %v135_v4 = vmul.f32 0.5, %v113_v59 }
  0x30   :  { %v208_v5 = vsel %vm200_vm5, %v204_v61, -1e+30  ;;  %v176_v6 = vsub.f32 %v160_v1, %v130_v0  ;;  %217 = vst [vmem:[%s591_s4 + $0x10] sm:$0xff] %v130_v0  ;;  %277 = vst [vmem:[%s591_s4 + $0x50] sm:$0xff] %v160_v1  ;;  %v121_v7 = vsub.f32 %v475_v8, %v117_v41  ;;  %v153_v9 = vadd.f32 %v117_v41, %v475_v8 }
  0x31   :  { %212 = vst [vmem:[%s592_s5 + $0x8] sm:$0xff] %v208_v5  ;;  %v189_v10 = vsub.f32 %v172_v3, %v148_v2  ;;  %273 = vst [vmem:[%s591_s4 + $0x30] sm:$0xff] %v148_v2  ;;  %v139_v11 = vsub.f32 %v477_v12, %v135_v4  ;;  %v165_v14 = vadd.f32 %v135_v4, %v477_v12 }
  0x32   :  { %281 = vst [vmem:[%s591_s4 + $0x70] sm:$0xff] %v172_v3  ;;  %v180_v15 = vadd.f32 1.0, %v176_v6  ;;  %v126_v16 = vmax.f32 %v121_v7, 0.0  ;;  %v157_v8 = vmax.f32 %v153_v9, 0.0 }
  0x33   :  { %v193_v17 = vadd.f32 1.0, %v189_v10  ;;  %v144_v18 = vmax.f32 %v139_v11, 0.0  ;;  %v169_v19 = vmax.f32 %v165_v14, 0.0 }
  0x34   :  { %vm185_vm6 = vcmp.ge.f32.partialorder %v180_v15, %v462_v57  ;;  %v131_v20 = vmin.f32 %v450_v46, %v126_v16  ;;  %v161_v21 = vmin.f32 %v450_v46, %v157_v8 }
  0x35   :  { %vm197_vm7 = vcmp.ge.f32.partialorder %v193_v17, %v462_v57  ;;  %v149_v12 = vmin.f32 %v460_v56, %v144_v18  ;;  %v173_v22 = vmin.f32 %v460_v56, %v169_v19 }
  0x36   :  { %vm201_vm8 = vmand %vm185_vm6, %vm197_vm7  ;;  %v177_v23 = vsub.f32 %v161_v21, %v131_v20  ;;  %218 = vst [vmem:[%s591_s4 + $0x18] sm:$0xff] %v131_v20 }
  0x37   :  { %278 = vst [vmem:[%s591_s4 + $0x58] sm:$0xff] %v161_v21  ;;  %v209_v24 = vsel %vm201_vm8, %v205_v13, -1e+30  ;;  %v190_v26 = vsub.f32 %v173_v22, %v149_v12  ;;  %274 = vst [vmem:[%s591_s4 + $0x38] sm:$0xff] %v149_v12 }
  0x38   :  { %282 = vst [vmem:[%s591_s4 + $0x78] sm:$0xff] %v173_v22  ;;  %213 = vst [vmem:[%s592_s5 + $0x10] sm:$0xff] %v209_v24  ;;  %v181_v46 = vadd.f32 1.0, %v177_v23 }
  0x39   :  { %v194_v56 = vadd.f32 1.0, %v190_v26 }
  0x3a   :  { %vm186_vm9 = vcmp.ge.f32.partialorder %v181_v46, %v462_v57 }
  0x3b   :  { %vm198_vm10 = vcmp.ge.f32.partialorder %v194_v56, %v462_v57 }
  0x3c   :  { %vm202_vm11 = vmand %vm186_vm9, %vm198_vm10 }
  0x3d   :  { %v210_v28 = vsel %vm202_vm11, %v206_v27, -1e+30 }
  0x3e   :  { %214 = vst [vmem:[%s592_s5 + $0x18] sm:$0xff] %v210_v28 }
  0x3f   :  { %242 = vsyncpa [#allocation3], 1 }

</bundles_post_ra>
